<compile_context>
chip_gen: v6e
topology: v6e:2x2x1
jax: 0.10.0
libtpu: 0.0.40
codegen_flags: <defaults>
</compile_context>

<pallas_src>
import functools

import jax
import jax.numpy as jnp
from jax.experimental import pallas as pl
from jax.experimental.pallas import tpu as pltpu

_LANE = 128


def _coupling_kernel(n_linear, n_act, hidden, *refs):
    """Fused coupling forward for one (D, TB) batch tile (batch on lanes).

    refs layout:
      [xT (D, TB), maskT (D, 1),
       W0 (2H, D), b0 (2H, 1),
       W1 (2H, 2H), b1 (2H, 1), ..., W_{L-1} (2D, 2H), b_{L-1} (2D, 1),
       uT_out (D, TB), logdetT_out (D, TB)]
    W0 is the vertical stack [Ws0^T; Wt0^T] (shared input mx); later W_i are
    block-diagonal fusions blockdiag(Wsi^T, Wti^T) of the scale/shift branches.
    """
    xT_ref, maskT_ref = refs[0], refs[1]
    w_refs = refs[2:2 + 2 * n_linear]
    uT_ref, ldT_ref = refs[-2], refs[-1]

    xT = xT_ref[...]                          # (D, TB) f32, batch on lanes
    maskT = maskT_ref[...]                    # (D, 1), broadcasts over lanes
    mxT = xT * maskT

    tb = xT.shape[1]
    if n_act > 0:
        # Rows [0, H) -> scale branch (tanh); rows [H, 2H) -> shift branch (relu).
        is_scale_row = (
            jax.lax.broadcasted_iota(jnp.int32, (2 * hidden, tb), 0) < hidden)

    # Layer 0 (both branches at once): (2H, D) @ (D, TB) -> (2H, TB).
    h = jnp.dot(w_refs[0][...], mxT,
                preferred_element_type=jnp.float32) + w_refs[1][...]

    for i in range(1, n_linear):
        if (i - 1) < n_act:                   # activation after linears 0..n_act-1
            h = jnp.where(is_scale_row, jnp.tanh(h), jnp.maximum(h, 0.0))
        h = jnp.dot(w_refs[2 * i][...], h,
                    preferred_element_type=jnp.float32) + w_refs[2 * i + 1][...]

    # h is (2D, TB): rows [0, D) = s^T, rows [D, 2D) = t^T.
    d = xT.shape[0]
    neg_sT = -h[:d, :]
    tT = h[d:, :]
    one_minus_m = 1.0 - maskT
    uT = mxT + one_minus_m * (jnp.exp(neg_sT) * (xT - tT))
    ldT = one_minus_m * neg_sT

    uT_ref[...] = uT.astype(uT_ref.dtype)
    ldT_ref[...] = ldT.astype(ldT_ref.dtype)


def _fuse_params(scale_params, shift_params):
    """Fuse scale & shift MLP params into transposed / block-diagonal form."""
    fused = []
    # Layer 0: both branches consume the same input mx -> vertical stack.
    ws0, bs0 = scale_params[0]
    wt0, bt0 = shift_params[0]
    w0 = jnp.concatenate([ws0.T, wt0.T], axis=0)                       # (2H, D)
    b0 = jnp.concatenate([bs0.reshape(-1, 1), bt0.reshape(-1, 1)], axis=0)
    fused.append((w0, b0))
    # Layers 1..L-1: independent branches -> block-diagonal weights.
    for (ws, bs), (wt, bt) in zip(scale_params[1:], shift_params[1:]):
        outs, ins = ws.shape[1], ws.shape[0]
        outt, int_ = wt.shape[1], wt.shape[0]
        w = jnp.zeros((outs + outt, ins + int_), jnp.float32)
        w = w.at[:outs, :ins].set(ws.T)
        w = w.at[outs:, ins:].set(wt.T)
        b = jnp.concatenate([bs.reshape(-1, 1), bt.reshape(-1, 1)], axis=0)
        fused.append((w, b))
    return fused


def _pick_batch_tile(B, block_b):
    """Lane-aligned batch tile: a multiple of 128, or the full batch."""
    if B < 2 * _LANE:
        return B                              # can't split on lane boundaries
    # Aim for >= 2 grid steps so both v7x TensorCores get work.
    half = ((B + 1) // 2) // _LANE * _LANE
    tb = min((block_b // _LANE) * _LANE, half)
    return max(tb, _LANE)


def coupling_forward(x, mask, scale_params, shift_params, *, block_b=8192):
    """x: (B, D); mask: (1, D) or (D,); params: list of (W(in,out), b(1,out))."""
    n_linear = len(scale_params)
    assert len(shift_params) == n_linear and n_linear >= 2
    n_act = n_linear - 2                      # == hidden_layers
    B, D = x.shape
    H = scale_params[0][0].shape[1]

    fused = _fuse_params(scale_params, shift_params)
    xT = x.T                                  # (D, B): batch on lanes
    maskT = jnp.reshape(mask, (D, 1)).astype(x.dtype)

    tb = _pick_batch_tile(B, block_b)
    grid = (pl.cdiv(B, tb),)

    flat_inputs = [xT, maskT]
    for w, b in fused:
        flat_inputs += [w, b]

    def resident_spec(a):
        # Full-array block, constant index -> fetched once, resident in VMEM.
        return pl.BlockSpec(a.shape, lambda i: (0, 0))

    stream_spec = pl.BlockSpec((D, tb), lambda i: (0, i))
    in_specs = [stream_spec] + [resident_spec(a) for a in flat_inputs[1:]]
    out_spec = stream_spec

    # Advisory cost estimate (block-diag matmul FLOPs + transcendentals + HBM bytes).
    param_elems = sum(w.size + b.size for w, b in fused)
    flops = 2 * B * sum(w.shape[0] * w.shape[1] for w, _ in fused)
    transcendentals = B * (n_act * 2 * H + D)      # tanh (both halves) + exp
    bytes_accessed = 4 * (3 * x.size + D + param_elems)

    kernel = functools.partial(_coupling_kernel, n_linear, n_act, H)
    uT, ldT = pl.pallas_call(
        kernel,
        grid=grid,
        out_shape=(
            jax.ShapeDtypeStruct((D, B), jnp.float32),
            jax.ShapeDtypeStruct((D, B), jnp.float32),
        ),
        in_specs=in_specs,
        out_specs=(out_spec, out_spec),
        compiler_params=pltpu.CompilerParams(
            dimension_semantics=("parallel",),
            # ~14 MiB footprint at TB=8192 -> explicit 32 MiB scoped limit is
            # comfortable headroom and safe on v7x (64 MiB physical VMEM).
            vmem_limit_bytes=32 * 1024 * 1024),
        cost_estimate=pl.CostEstimate(
            flops=flops,
            transcendentals=transcendentals,
            bytes_accessed=bytes_accessed),
    )(*flat_inputs)

    # Transpose back in the wrapper (pure layout plumbing on tiny (D, B) arrays).
    return uT.T, ldT.T


def _reference_forward(x, mask, scale_params, shift_params, n_act):
    def mlp(h, params, act):
        for i, (w, b) in enumerate(params):
            h = h @ w + b
            if i < n_act:
                h = act(h)
        return h

    mx = x * mask
    s = mlp(mx, scale_params, jnp.tanh)
    t = mlp(mx, shift_params, lambda v: jnp.maximum(v, 0.0))
    u = mx + (1.0 - mask) * (jnp.exp(-s) * (x - t))
    logdet = (1.0 - mask) * (-s)
    return u, logdet


if __name__ == "__main__":
    # Module hyperparameters (additional_par_size=None).
    old_par_size = 8       # D
    hidden_size = 32       # H
    hidden_layers = 2
    batch = 8

    D, H = old_par_size, hidden_size
    n_linear = hidden_layers + 2

    key = jax.random.PRNGKey(0)

    # Alternating binary mask (as in RealNVP couplings).
    mask = jnp.asarray([(i % 2) for i in range(D)], dtype=jnp.float32).reshape(1, D)

    # Deterministic parameter init. Linear i stored as (in_i, out_i).
    dims = [D] + [H] * (hidden_layers + 1) + [D]

    def init_mlp(key):
        params = []
        for i in range(n_linear):
            key, kw, kb = jax.random.split(key, 3)
            fan_in, fan_out = dims[i], dims[i + 1]
            w = jax.random.normal(kw, (fan_in, fan_out), jnp.float32) * 0.1
            b = jax.random.normal(kb, (1, fan_out), jnp.float32) * 0.01
            params.append((w, b))
        return key, params

    key, scale_params = init_mlp(key)
    key, shift_params = init_mlp(key)

    # Test 1: small demo batch (single grid step).
    key, kx = jax.random.split(key)
    x = jax.random.normal(kx, (batch, D), jnp.float32)
    u, logdet = coupling_forward(x, mask, scale_params, shift_params)
    jax.block_until_ready((u, logdet))
    u_ref, ld_ref = _reference_forward(x, mask, scale_params, shift_params, hidden_layers)
    assert jnp.allclose(u, u_ref, atol=1e-4, rtol=1e-4)
    assert jnp.allclose(logdet, ld_ref, atol=1e-4, rtol=1e-4)

    # Test 2: multi-tile pipelined path with lane-dense 128-wide batch tiles
    # and a padded tail tile (300 % 128 != 0; masked writeback on the tail).
    key, kx2 = jax.random.split(key)
    x2 = jax.random.normal(kx2, (300, D), jnp.float32)
    u2, logdet2 = coupling_forward(x2, mask, scale_params, shift_params, block_b=128)
    jax.block_until_ready((u2, logdet2))
    u2_ref, ld2_ref = _reference_forward(x2, mask, scale_params, shift_params, hidden_layers)
    assert jnp.allclose(u2, u2_ref, atol=1e-4, rtol=1e-4)
    assert jnp.allclose(logdet2, ld2_ref, atol=1e-4, rtol=1e-4)

    print("KERNEL_OK")
</pallas_src>

<mosaic_0001>
module attributes {stable_mosaic.version = 11 : i64} {
  func.func @_coupling_kernel(%arg0: i32, %arg1: memref<8x8xf32, #tpu.memory_space<vmem>>, %arg2: memref<8x1xf32, #tpu.memory_space<vmem>>, %arg3: memref<64x8xf32, #tpu.memory_space<vmem>>, %arg4: memref<64x1xf32, #tpu.memory_space<vmem>>, %arg5: memref<64x64xf32, #tpu.memory_space<vmem>>, %arg6: memref<64x1xf32, #tpu.memory_space<vmem>>, %arg7: memref<64x64xf32, #tpu.memory_space<vmem>>, %arg8: memref<64x1xf32, #tpu.memory_space<vmem>>, %arg9: memref<16x64xf32, #tpu.memory_space<vmem>>, %arg10: memref<16x1xf32, #tpu.memory_space<vmem>>, %arg11: memref<8x8xf32, #tpu.memory_space<vmem>>, %arg12: memref<8x8xf32, #tpu.memory_space<vmem>>) attributes {dimension_semantics = [#tpu.dimension_semantics<parallel>], iteration_bounds = array<i64: 1>, scalar_prefetch = 0 : i64, scratch_operands = 0 : i64, tpu.core_type = #tpu.core_type<tc>, window_params = [{transform_indices = @transform_0, window_bounds = array<i64: 8, 8>}, {pipeline_mode = #tpu.pipeline_mode<synchronous>, transform_indices = @transform_1, window_bounds = array<i64: 8, 1>}, {pipeline_mode = #tpu.pipeline_mode<synchronous>, transform_indices = @transform_2, window_bounds = array<i64: 64, 8>}, {pipeline_mode = #tpu.pipeline_mode<synchronous>, transform_indices = @transform_3, window_bounds = array<i64: 64, 1>}, {pipeline_mode = #tpu.pipeline_mode<synchronous>, transform_indices = @transform_4, window_bounds = array<i64: 64, 64>}, {pipeline_mode = #tpu.pipeline_mode<synchronous>, transform_indices = @transform_5, window_bounds = array<i64: 64, 1>}, {pipeline_mode = #tpu.pipeline_mode<synchronous>, transform_indices = @transform_6, window_bounds = array<i64: 64, 64>}, {pipeline_mode = #tpu.pipeline_mode<synchronous>, transform_indices = @transform_7, window_bounds = array<i64: 64, 1>}, {pipeline_mode = #tpu.pipeline_mode<synchronous>, transform_indices = @transform_8, window_bounds = array<i64: 16, 64>}, {pipeline_mode = #tpu.pipeline_mode<synchronous>, transform_indices = @transform_9, window_bounds = array<i64: 16, 1>}, {transform_indices = @transform_10, window_bounds = array<i64: 8, 8>}, {transform_indices = @transform_11, window_bounds = array<i64: 8, 8>}]} {
    %c0 = arith.constant 0 : index
    %c0_0 = arith.constant 0 : index
    %0 = vector.load %arg1[%c0, %c0_0] : memref<8x8xf32, #tpu.memory_space<vmem>>, vector<8x8xf32>
    %c0_1 = arith.constant 0 : index
    %c0_2 = arith.constant 0 : index
    %1 = vector.load %arg2[%c0_1, %c0_2] : memref<8x1xf32, #tpu.memory_space<vmem>>, vector<8x1xf32>
    %2 = vector.broadcast %1 : vector<8x1xf32> to vector<8x8xf32>
    %3 = arith.mulf %0, %2 : vector<8x8xf32>
    %4 = tpu.iota {dimensions = array<i32: 0>} : vector<64x8xi32>
    %c32_i32 = arith.constant 32 : i32
    %5 = vector.broadcast %c32_i32 : i32 to vector<64x8xi32>
    %6 = arith.cmpi slt, %4, %5 : vector<64x8xi32>
    %c0_3 = arith.constant 0 : index
    %c0_4 = arith.constant 0 : index
    %7 = vector.load %arg3[%c0_3, %c0_4] : memref<64x8xf32, #tpu.memory_space<vmem>>, vector<64x8xf32>
    %cst = arith.constant dense<0.000000e+00> : vector<64x8xf32>
    %8 = tpu.matmul %7, %3, %cst {dimension_numbers = #tpu.dot_dimension_numbers<[1], [0], [0], [1], [0, 0, 1, 1], [], []>} : vector<64x8xf32>, vector<8x8xf32>, vector<64x8xf32> -> vector<64x8xf32>
    %c0_5 = arith.constant 0 : index
    %c0_6 = arith.constant 0 : index
    %9 = vector.load %arg4[%c0_5, %c0_6] : memref<64x1xf32, #tpu.memory_space<vmem>>, vector<64x1xf32>
    %10 = vector.broadcast %9 : vector<64x1xf32> to vector<64x8xf32>
    %11 = arith.addf %8, %10 : vector<64x8xf32>
    %12 = math.tanh %11 : vector<64x8xf32>
    %cst_7 = arith.constant 0.000000e+00 : f32
    %13 = vector.broadcast %cst_7 : f32 to vector<64x8xf32>
    %14 = arith.maximumf %11, %13 : vector<64x8xf32>
    %15 = arith.select %6, %12, %14 : vector<64x8xi1>, vector<64x8xf32>
    %c0_8 = arith.constant 0 : index
    %c0_9 = arith.constant 0 : index
    %16 = vector.load %arg5[%c0_8, %c0_9] : memref<64x64xf32, #tpu.memory_space<vmem>>, vector<64x64xf32>
    %cst_10 = arith.constant dense<0.000000e+00> : vector<64x8xf32>
    %17 = tpu.matmul %16, %15, %cst_10 {dimension_numbers = #tpu.dot_dimension_numbers<[1], [0], [0], [1], [0, 0, 1, 1], [], []>} : vector<64x64xf32>, vector<64x8xf32>, vector<64x8xf32> -> vector<64x8xf32>
    %c0_11 = arith.constant 0 : index
    %c0_12 = arith.constant 0 : index
    %18 = vector.load %arg6[%c0_11, %c0_12] : memref<64x1xf32, #tpu.memory_space<vmem>>, vector<64x1xf32>
    %19 = vector.broadcast %18 : vector<64x1xf32> to vector<64x8xf32>
    %20 = arith.addf %17, %19 : vector<64x8xf32>
    %21 = math.tanh %20 : vector<64x8xf32>
    %cst_13 = arith.constant 0.000000e+00 : f32
    %22 = vector.broadcast %cst_13 : f32 to vector<64x8xf32>
    %23 = arith.maximumf %20, %22 : vector<64x8xf32>
    %24 = arith.select %6, %21, %23 : vector<64x8xi1>, vector<64x8xf32>
    %c0_14 = arith.constant 0 : index
    %c0_15 = arith.constant 0 : index
    %25 = vector.load %arg7[%c0_14, %c0_15] : memref<64x64xf32, #tpu.memory_space<vmem>>, vector<64x64xf32>
    %cst_16 = arith.constant dense<0.000000e+00> : vector<64x8xf32>
    %26 = tpu.matmul %25, %24, %cst_16 {dimension_numbers = #tpu.dot_dimension_numbers<[1], [0], [0], [1], [0, 0, 1, 1], [], []>} : vector<64x64xf32>, vector<64x8xf32>, vector<64x8xf32> -> vector<64x8xf32>
    %c0_17 = arith.constant 0 : index
    %c0_18 = arith.constant 0 : index
    %27 = vector.load %arg8[%c0_17, %c0_18] : memref<64x1xf32, #tpu.memory_space<vmem>>, vector<64x1xf32>
    %28 = vector.broadcast %27 : vector<64x1xf32> to vector<64x8xf32>
    %29 = arith.addf %26, %28 : vector<64x8xf32>
    %c0_19 = arith.constant 0 : index
    %c0_20 = arith.constant 0 : index
    %30 = vector.load %arg9[%c0_19, %c0_20] : memref<16x64xf32, #tpu.memory_space<vmem>>, vector<16x64xf32>
    %cst_21 = arith.constant dense<0.000000e+00> : vector<16x8xf32>
    %31 = tpu.matmul %30, %29, %cst_21 {dimension_numbers = #tpu.dot_dimension_numbers<[1], [0], [0], [1], [0, 0, 1, 1], [], []>} : vector<16x64xf32>, vector<64x8xf32>, vector<16x8xf32> -> vector<16x8xf32>
    %c0_22 = arith.constant 0 : index
    %c0_23 = arith.constant 0 : index
    %32 = vector.load %arg10[%c0_22, %c0_23] : memref<16x1xf32, #tpu.memory_space<vmem>>, vector<16x1xf32>
    %33 = vector.broadcast %32 : vector<16x1xf32> to vector<16x8xf32>
    %34 = arith.addf %31, %33 : vector<16x8xf32>
    %35 = vector.extract_strided_slice %34 {offsets = [0, 0], sizes = [8, 8], strides = [1, 1]} : vector<16x8xf32> to vector<8x8xf32>
    %cst_24 = arith.constant 0.000000e+00 : f32
    %36 = vector.broadcast %cst_24 : f32 to vector<8x8xf32>
    %37 = arith.subf %36, %35 : vector<8x8xf32>
    %38 = vector.extract_strided_slice %34 {offsets = [8, 0], sizes = [8, 8], strides = [1, 1]} : vector<16x8xf32> to vector<8x8xf32>
    %cst_25 = arith.constant 1.000000e+00 : f32
    %39 = vector.broadcast %cst_25 : f32 to vector<8x1xf32>
    %40 = arith.subf %39, %1 : vector<8x1xf32>
    %41 = math.exp %37 : vector<8x8xf32>
    %42 = arith.subf %0, %38 : vector<8x8xf32>
    %43 = arith.mulf %41, %42 : vector<8x8xf32>
    %44 = vector.broadcast %40 : vector<8x1xf32> to vector<8x8xf32>
    %45 = arith.mulf %44, %43 : vector<8x8xf32>
    %46 = arith.addf %3, %45 : vector<8x8xf32>
    %47 = vector.broadcast %40 : vector<8x1xf32> to vector<8x8xf32>
    %48 = arith.mulf %47, %37 : vector<8x8xf32>
    %c0_26 = arith.constant 0 : index
    %c0_27 = arith.constant 0 : index
    %49 = vector.load %arg11[%c0_26, %c0_27] : memref<8x8xf32, #tpu.memory_space<vmem>>, vector<8x8xf32>
    tpu.vector_store %arg11[%c0_26, %c0_27], %46 {strides = array<i32>} : memref<8x8xf32, #tpu.memory_space<vmem>>, vector<8x8xf32>,
    %c0_28 = arith.constant 0 : index
    %c0_29 = arith.constant 0 : index
    %50 = vector.load %arg12[%c0_28, %c0_29] : memref<8x8xf32, #tpu.memory_space<vmem>>, vector<8x8xf32>
    tpu.vector_store %arg12[%c0_28, %c0_29], %48 {strides = array<i32>} : memref<8x8xf32, #tpu.memory_space<vmem>>, vector<8x8xf32>,
    return
  }
  func.func @transform_0(%arg0: i32) -> (i32, i32) {
    %c0_i32 = arith.constant 0 : i32
    %c0_i32_0 = arith.constant 0 : i32
    return %c0_i32, %arg0 : i32, i32
  }
  func.func @transform_1(%arg0: i32) -> (i32, i32) {
    %c0_i32 = arith.constant 0 : i32
    %c0_i32_0 = arith.constant 0 : i32
    %c0_i32_1 = arith.constant 0 : i32
    return %c0_i32, %c0_i32_0 : i32, i32
  }
  func.func @transform_2(%arg0: i32) -> (i32, i32) {
    %c0_i32 = arith.constant 0 : i32
    %c0_i32_0 = arith.constant 0 : i32
    %c0_i32_1 = arith.constant 0 : i32
    return %c0_i32, %c0_i32_0 : i32, i32
  }
  func.func @transform_3(%arg0: i32) -> (i32, i32) {
    %c0_i32 = arith.constant 0 : i32
    %c0_i32_0 = arith.constant 0 : i32
    %c0_i32_1 = arith.constant 0 : i32
    return %c0_i32, %c0_i32_0 : i32, i32
  }
  func.func @transform_4(%arg0: i32) -> (i32, i32) {
    %c0_i32 = arith.constant 0 : i32
    %c0_i32_0 = arith.constant 0 : i32
    %c0_i32_1 = arith.constant 0 : i32
    return %c0_i32, %c0_i32_0 : i32, i32
  }
  func.func @transform_5(%arg0: i32) -> (i32, i32) {
    %c0_i32 = arith.constant 0 : i32
    %c0_i32_0 = arith.constant 0 : i32
    %c0_i32_1 = arith.constant 0 : i32
    return %c0_i32, %c0_i32_0 : i32, i32
  }
  func.func @transform_6(%arg0: i32) -> (i32, i32) {
    %c0_i32 = arith.constant 0 : i32
    %c0_i32_0 = arith.constant 0 : i32
    %c0_i32_1 = arith.constant 0 : i32
    return %c0_i32, %c0_i32_0 : i32, i32
  }
  func.func @transform_7(%arg0: i32) -> (i32, i32) {
    %c0_i32 = arith.constant 0 : i32
    %c0_i32_0 = arith.constant 0 : i32
    %c0_i32_1 = arith.constant 0 : i32
    return %c0_i32, %c0_i32_0 : i32, i32
  }
  func.func @transform_8(%arg0: i32) -> (i32, i32) {
    %c0_i32 = arith.constant 0 : i32
    %c0_i32_0 = arith.constant 0 : i32
    %c0_i32_1 = arith.constant 0 : i32
    return %c0_i32, %c0_i32_0 : i32, i32
  }
  func.func @transform_9(%arg0: i32) -> (i32, i32) {
    %c0_i32 = arith.constant 0 : i32
    %c0_i32_0 = arith.constant 0 : i32
    %c0_i32_1 = arith.constant 0 : i32
    return %c0_i32, %c0_i32_0 : i32, i32
  }
  func.func @transform_10(%arg0: i32) -> (i32, i32) {
    %c0_i32 = arith.constant 0 : i32
    %c0_i32_0 = arith.constant 0 : i32
    return %c0_i32, %arg0 : i32, i32
  }
  func.func @transform_11(%arg0: i32) -> (i32, i32) {
    %c0_i32 = arith.constant 0 : i32
    %c0_i32_0 = arith.constant 0 : i32
    return %c0_i32, %arg0 : i32, i32
  }
}

</mosaic_0001>

<bundles_post_ra>
// kernel: tpu_custom_call.1
= control target key start
LH: loop header
LB: loop body
LE: loop exit
PB: predicated region body
PF: predicated region fallthrough
CT: control target
= control target key end

     0   :  { %17 = vsyncpa [#allocation3], 0  ;;  %v1041_v1 = vmov 0   ;;  %vm120_vm0 = vcmask 64512   ;;  %s1309_s0 = inlined_call_operand.vmem [shape: f32[8,8], index: 0, kind: input, shape index: {}]   ;;  %s1310_s1 = inlined_call_operand.vmem [shape: f32[8,1], index: 1, kind: input, shape index: {}]   ;;  %s1311_s2 = inlined_call_operand.vmem [shape: f32[64,8], index: 2, kind: input, shape index: {}]   ;;  %s1312_s3 = inlined_call_operand.vmem [shape: f32[64,1], index: 3, kind: input, shape index: {}]   ;;  %s1313_s4 = inlined_call_operand.vmem [shape: f32[64,64], index: 4, kind: input, shape index: {}]   ;;  %s1314_s5 = inlined_call_operand.vmem [shape: f32[64,1], index: 5, kind: input, shape index: {}]   ;;  %s1315_s6 = inlined_call_operand.vmem [shape: f32[64,64], index: 6, kind: input, shape index: {}]   ;;  %s1316_s7 = inlined_call_operand.vmem [shape: f32[64,1], index: 7, kind: input, shape index: {}]   ;;  %s1317_s8 = inlined_call_operand.vmem [shape: f32[16,64], index: 8, kind: input, shape index: {}]   ;;  %s1318_s9 = inlined_call_operand.vmem [shape: f32[16,1], index: 9, kind: input, shape index: {}]   ;;  %s1319_s10 = inlined_call_operand.hbm [shape: f32[8,8], index: 10, kind: output, shape index: {0}]   ;;  %s1320_s11 = inlined_call_operand.hbm [shape: f32[8,8], index: 11, kind: output, shape index: {1}]  }
   0x1   :  { %v40_v0 = vld [vmem:[%s1310_s1] sm:$0xff]  ;;  %977 = vset.pattern.permute.xlu0 %v1041_v1  ;;  %978 = vset.pattern.permute.xlu1 %v1041_v1  ;;  %v75_v2 = vld [vmem:[%s1312_s3 + $0x18] sm:$0xff] }
   0x2   :  { %43 = vperm.xlu0 %977, %v40_v0   ;;  %v64_v3 = vld [vmem:[%s1311_s2] sm:$0xff] }
   0x3   :  { %887 = vmatprep.mubr.msk.f32.mxu0 %vm120_vm0, %v64_v3 }
   0x6   :  { %97 = vperm.xlu0 %977, %v75_v2  }
   0x7   :  { %18 = vsyncpa [#allocation5], 0  ;;  %v79_v4 = vld [vmem:[%s1312_s3 + $0x38] sm:$0xff]  ;;  %v78_v5 = vld [vmem:[%s1312_s3 + $0x30] sm:$0xff]  ;;  %v765_v29 = vsub.f32 1.0, %v40_v0  ;;  %vm330_vm1 = vcmask 523264  }
   0x8   :  { %v76_v6 = vld [vmem:[%s1312_s3 + $0x20] sm:$0xff]  ;;  %v284_v7 = vld [vmem:[%s1314_s5 + $0x10] sm:$0xff]  ;;  %v289_v9 = vld [vmem:[%s1314_s5 + $0x38] sm:$0xff]  ;;  %s1042_s28 = smov [#allocation4]  }
   0x9   :  { %v74_v8 = vld [vmem:[%s1312_s3 + $0x10] sm:$0xff]  ;;  %v73_v10 = vld [vmem:[%s1312_s3 + $0x8] sm:$0xff]  ;;  %v72_v12 = vld [vmem:[%s1312_s3] sm:$0xff]  ;;  %s796_s29 = sshll.u32 %s1042_s28, 4  ;;  %s797_s29 = int_to_ptr.vmem [resolvable:$true] %s796_s29 }
   0xa   :  { %117 = vperm.xlu0 %977, %v79_v4   ;;  %92 = vperm.xlu1 %978, %v74_v8   ;;  %v288_v11 = vld [vmem:[%s1314_s5 + $0x30] sm:$0xff]  ;;  %v286_v13 = vld [vmem:[%s1314_s5 + $0x20] sm:$0xff]  ;;  %v77_v14 = vld [vmem:[%s1312_s3 + $0x28] sm:$0xff]  ;;  %s997_s30 = scalar_lea.vmem %s797_s29, 128  ;;  %p1002_p1 = scmp.lt.s32.totalorder %s797_s29, %s797_s29 }
   0xb   :  { %v498_v15 = vld [vmem:[%s1316_s7 + $0x30] sm:$0xff]  ;;  %v285_v16 = vld [vmem:[%s1314_s5 + $0x18] sm:$0xff]  ;;  %v496_v17 = vld [vmem:[%s1316_s7 + $0x20] sm:$0xff]  ;;  %p998_p0 = scmp.ne.s32.totalorder %s797_s29, %s997_s30  ;;  %p1003_p2 = scmp.lt.s32.totalorder %s997_s30, %s997_s30 }
   0xc   :  { %v283_v18 = vld [vmem:[%s1314_s5 + $0x8] sm:$0xff]  ;;  %v494_v19 = vld [vmem:[%s1316_s7 + $0x10] sm:$0xff]  ;;  %v282_v20 = vld [vmem:[%s1314_s5] sm:$0xff] }
   0xd   :  { %v492_v21 = vld [vmem:[%s1316_s7] sm:$0xff]  ;;  %v287_v22 = vld [vmem:[%s1314_s5 + $0x28] sm:$0xff]  ;;  %v499_v24 = vld [vmem:[%s1316_s7 + $0x38] sm:$0xff]  ;;  %p1004_p3 = por %p1003_p2, %p1002_p1 }
   0xe   :  { %112 = vperm.xlu0 %977, %v78_v5   ;;  %87 = vperm.xlu1 %978, %v73_v10   ;;  %v672_v23 = vld [vmem:[%s1318_s9 + $0x8] sm:$0xff]  ;;  %v495_v26 = vld [vmem:[%s1316_s7 + $0x18] sm:$0xff]  ;;  %v671_v28 = vld [vmem:[%s1318_s9] sm:$0xff] }
   0xf   :  { %v497_v25 = vld [vmem:[%s1316_s7 + $0x28] sm:$0xff]  ;;  %v1192_v30 = vld [vmem:[%s1309_s0] sm:$0xff]  ;;  %v66_v34 = vld [vmem:[%s1311_s2 + $0x10] sm:$0xff]  ;;  %p1005_p4 = pnand %p1004_p3, %p998_p0 }
  0x10   :  { %v493_v27 = vld [vmem:[%s1316_s7 + $0x8] sm:$0xff]  ;;  %v67_v35 = vld [vmem:[%s1311_s2 + $0x18] sm:$0xff]  ;;  %v68_v36 = vld [vmem:[%s1311_s2 + $0x20] sm:$0xff] }
  0x11   :  { %v65_v33 = vld [vmem:[%s1311_s2 + $0x8] sm:$0xff]  ;;  %v70_v38 = vld [vmem:[%s1311_s2 + $0x30] sm:$0xff]  ;;  %v71_v39 = vld [vmem:[%s1311_s2 + $0x38] sm:$0xff] }
  0x12   :  { %102 = vperm.xlu0 %977, %v76_v6   ;;  %82 = vperm.xlu1 %978, %v72_v12   ;;  %v69_v37 = vld [vmem:[%s1311_s2 + $0x28] sm:$0xff]  ;;  %v274_v40 = vld [vmem:[%s1313_s4] sm:$0xff]  ;;  %v276_v10 = vld [vmem:[%s1313_s4 + $0x10] sm:$0xff] }
  0x13   :  { %915 = vmatprep.mubr.msk.f32.mxu1 %vm330_vm1, %v274_v40  ;;  %v278_v12 = vld [vmem:[%s1313_s4 + $0x20] sm:$0xff] }
  0x16   :  { %302 = vperm.xlu0 %977, %v284_v7   ;;  %107 = vperm.xlu1 %978, %v77_v14   ;;  %v280_v14 = vld [vmem:[%s1313_s4 + $0x30] sm:$0xff] }
  0x1a   :  { %327 = vperm.xlu0 %977, %v289_v9   ;;  %307 = vperm.xlu1 %978, %v285_v16   ;;  %v275_v9 = vld [vmem:[%s1313_s4 + $0x8] sm:$0xff]  ;;  %v484_v16 = vld [vmem:[%s1315_s6] sm:$0xff] }
  0x1e   :  { %322 = vperm.xlu0 %977, %v288_v11   ;;  %297 = vperm.xlu1 %978, %v283_v18   ;;  %v277_v11 = vld [vmem:[%s1313_s4 + $0x18] sm:$0xff] }
  0x22   :  { %312 = vperm.xlu0 %977, %v286_v13   ;;  %292 = vperm.xlu1 %978, %v282_v20   ;;  %v279_v13 = vld [vmem:[%s1313_s4 + $0x28] sm:$0xff] }
  0x26   :  { %532 = vperm.xlu0 %977, %v498_v15   ;;  %317 = vperm.xlu1 %978, %v287_v22   ;;  %v281_v15 = vld [vmem:[%s1313_s4 + $0x38] sm:$0xff] }
  0x2a   :  { %522 = vperm.xlu0 %977, %v496_v17   ;;  %537 = vperm.xlu1 %978, %v499_v24  }
  0x2e   :  { %512 = vperm.xlu0 %977, %v494_v19   ;;  %527 = vperm.xlu1 %978, %v497_v25  }
  0x32   :  { %502 = vperm.xlu0 %977, %v492_v21   ;;  %517 = vperm.xlu1 %978, %v495_v26  }
  0x36   :  { %680 = vperm.xlu0 %977, %v672_v23   ;;  %507 = vperm.xlu1 %978, %v493_v27  }
  0x3a   :  { %675 = vperm.xlu1 %978, %v671_v28  }
  0x3e   :  { %772 = vperm.xlu1 %978, %v765_v29  }
  0x7d   :  { %v44_v31 = vpop.permute.xlu0 %43 }
  0x7e   :  { %v1195_v32 = vmul.f32 %v44_v31, %v1192_v30 }
  0x80   :  { %885 = vmatprep.subr.mxu0 %v1195_v32 }
  0x81   :  { %886 = vmatpush3.msra.mxu0 %v1195_v32  ;;  %v98_v42 = vpop.permute.xlu0 %97 }
  0x82   :  { %888 = vmatmul.mubr.msk.f32.vlgmr.msra.gmra.mxu0 %vm120_vm0, %v65_v33 }
  0x83   :  { %890 = vmatprep.mubr.msk.f32.mxu0 %vm120_vm0, %v66_v34 }
  0x85   :  { %v93_v41 = vpop.permute.xlu1 %92  ;;  %v118_v46 = vpop.permute.xlu0 %117 }
  0x86   :  { %891 = vmatmul.mubr.msk.f32.gmra.mxu0 %vm120_vm0, %v67_v35 }
  0x87   :  { %893 = vmatprep.mubr.msk.f32.mxu0 %vm120_vm0, %v68_v36 }
  0x89   :  { %v88_v44 = vpop.permute.xlu1 %87  ;;  %v113_v53 = vpop.permute.xlu0 %112 }
  0x8a   :  { %894 = vmatmul.mubr.msk.f32.gmra.mxu0 %vm120_vm0, %v69_v37 }
  0x8b   :  { %896 = vmatprep.mubr.msk.f32.mxu0 %vm120_vm0, %v70_v38 }
  0x8d   :  { %v83_v50 = vpop.permute.xlu1 %82  ;;  %v103_v0 = vpop.permute.xlu0 %102 }
  0x8e   :  { %897 = vmatmul.mubr.msk.f32.gmra.mxu0 %vm120_vm0, %v71_v39 }
  0x8f   :  { %943 = vmatprep.mubr.msk.f32.mxu0 %vm330_vm1, %v484_v16 }
  0x91   :  { %v108_v59 = vpop.permute.xlu1 %107  ;;  %v303_v18 = vpop.permute.xlu0 %302 }
  0x95   :  { %v308_v17 = vpop.permute.xlu1 %307  ;;  %v328_v22 = vpop.permute.xlu0 %327 }
  0x99   :  { %v298_v20 = vpop.permute.xlu1 %297  ;;  %v323_v29 = vpop.permute.xlu0 %322 }
  0x9d   :  { %v293_v26 = vpop.permute.xlu1 %292 }
  0xa1   :  { %v318_v37 = vpop.permute.xlu1 %317 }
 0x142   :  { %v889_v43 = vpop.f32.mrf.mxu0 }
 0x143   :  { %v217_v55 = vadd.f32 %v889_v43, %v88_v44 }
 0x144   :  { %v211_v45 = vpop.f32.mrf.mxu0 }
 0x145   :  { %v212_v57 = vadd.f32 %v211_v45, %v83_v50 }
 0x146   :  { %v892_v47 = vpop.f32.mrf.mxu0 }
 0x147   :  { %v227_v49 = vadd.f32 %v892_v47, %v98_v42  ;;  %v313_v42 = vpop.permute.xlu0 %312 }
 0x148   :  { %v221_v48 = vpop.f32.mrf.mxu0 }
 0x149   :  { %v222_v52 = vadd.f32 %v221_v48, %v93_v41  ;;  %979 = vtanh.f32 %v227_v49 }
 0x14a   :  { %v895_v51 = vpop.f32.mrf.mxu0 }
 0x14b   :  { %981 = vtanh.f32 %v222_v52  ;;  %v237_v61 = vadd.f32 %v895_v51, %v108_v59  ;;  %v485_v51 = vld [vmem:[%s1315_s6 + $0x8] sm:$0xff]  ;;  %v486_v52 = vld [vmem:[%s1315_s6 + $0x10] sm:$0xff] }
 0x14c   :  { %v231_v54 = vpop.f32.mrf.mxu0  ;;  %983 = vtanh.f32 %v217_v55  ;;  %v489_v55 = vld [vmem:[%s1315_s6 + $0x28] sm:$0xff] }
 0x14d   :  { %985 = vtanh.f32 %v212_v57  ;;  %v232_v1 = vadd.f32 %v231_v54, %v103_v0  ;;  %v263_v3 = vmax.f32 %v237_v61, 0.0  ;;  %v488_v54 = vld [vmem:[%s1315_s6 + $0x20] sm:$0xff]  ;;  %v491_v57 = vld [vmem:[%s1315_s6 + $0x38] sm:$0xff]  ;;  %v533_v0 = vpop.permute.xlu0 %532 }
 0x14e   :  { %v898_v56 = vpop.f32.mrf.mxu0 }
 0x14f   :  { %v247_v58 = vadd.f32 %v898_v56, %v118_v46  ;;  %v262_v4 = vmax.f32 %v232_v1, 0.0  ;;  %v490_v56 = vld [vmem:[%s1315_s6 + $0x30] sm:$0xff] }
 0x150   :  { %v241_v60 = vpop.f32.mrf.mxu0 }
 0x151   :  { %v265_v62 = vmax.f32 %v247_v58, 0.0  ;;  %v242_v63 = vadd.f32 %v241_v60, %v113_v53  ;;  %v487_v53 = vld [vmem:[%s1315_s6 + $0x18] sm:$0xff]  ;;  %v669_v58 = vld [vmem:[%s1317_s8] sm:$0xff] }
 0x153   :  { %v264_v2 = vmax.f32 %v242_v63, 0.0  ;;  %899 = vmatprep.subr.mxu1 %v265_v62 }
 0x154   :  { %900 = vmatpush3.msra.mxu1 %v265_v62  ;;  %v538_v62 = vpop.permute.xlu1 %537 }
 0x155   :  { %901 = vmatprep.subr.mxu1 %v264_v2 }
 0x156   :  { %902 = vmatpush3.msra.mxu1 %v264_v2  ;;  %v980_v5 = vpop.eup %979 }
 0x157   :  { %903 = vmatprep.subr.mxu1 %v263_v3 }
 0x158   :  { %904 = vmatpush3.msra.mxu1 %v263_v3  ;;  %v982_v6 = vpop.eup %981  ;;  %v528_v3 = vpop.permute.xlu1 %527 }
 0x159   :  { %905 = vmatprep.subr.mxu1 %v262_v4  ;;  %v984_v7 = vpop.eup %983 }
 0x15a   :  { %906 = vmatpush3.msra.mxu1 %v262_v4  ;;  %v986_v8 = vpop.eup %985 }
 0x15b   :  { %907 = vmatprep.subr.mxu1 %v980_v5 }
 0x15c   :  { %908 = vmatpush3.msra.mxu1 %v980_v5 }
 0x15d   :  { %909 = vmatprep.subr.mxu1 %v982_v6 }
 0x15e   :  { %910 = vmatpush3.msra.mxu1 %v982_v6  ;;  %v523_v6 = vpop.permute.xlu0 %522 }
 0x15f   :  { %911 = vmatprep.subr.mxu1 %v984_v7 }
 0x160   :  { %912 = vmatpush3.msra.mxu1 %v984_v7 }
 0x161   :  { %913 = vmatprep.subr.mxu1 %v986_v8 }
 0x162   :  { %914 = vmatpush3.msra.mxu1 %v986_v8 }
 0x163   :  { %916 = vmatmul.mubr.msk.f32.vlgmr.msra.gmra.mxu1 %vm330_vm1, %v275_v9 }
 0x164   :  { %918 = vmatprep.mubr.msk.f32.mxu1 %vm330_vm1, %v276_v10  ;;  %v518_v10 = vpop.permute.xlu1 %517 }
 0x167   :  { %919 = vmatmul.mubr.msk.f32.gmra.mxu1 %vm330_vm1, %v277_v11 }
 0x168   :  { %921 = vmatprep.mubr.msk.f32.mxu1 %vm330_vm1, %v278_v12  ;;  %v513_v12 = vpop.permute.xlu0 %512 }
 0x16b   :  { %922 = vmatmul.mubr.msk.f32.gmra.mxu1 %vm330_vm1, %v279_v13 }
 0x16c   :  { %924 = vmatprep.mubr.msk.f32.mxu1 %vm330_vm1, %v280_v14 }
 0x16f   :  { %925 = vmatmul.mubr.msk.f32.gmra.mxu1 %vm330_vm1, %v281_v15  ;;  %v508_v15 = vpop.permute.xlu1 %507 }
 0x170   :  { %971 = vmatprep.mubr.msk.f32.mxu1 %vm330_vm1, %v669_v58 }
 0x223   :  { %v917_v19 = vpop.f32.mrf.mxu1 }
 0x224   :  { %v427_v33 = vadd.f32 %v917_v19, %v298_v20  ;;  %v670_v19 = vld [vmem:[%s1317_s8 + $0x8] sm:$0xff]  ;;  %v676_v20 = vpop.permute.xlu1 %675 }
 0x225   :  { %v421_v21 = vpop.f32.mrf.mxu1 }
 0x226   :  { %v422_v35 = vadd.f32 %v421_v21, %v293_v26 }
 0x227   :  { %v920_v23 = vpop.f32.mrf.mxu1 }
 0x228   :  { %v437_v25 = vadd.f32 %v920_v23, %v308_v17  ;;  %v503_v17 = vpop.permute.xlu0 %502 }
 0x229   :  { %v431_v24 = vpop.f32.mrf.mxu1 }
 0x22a   :  { %v432_v28 = vadd.f32 %v431_v24, %v303_v18  ;;  %987 = vtanh.f32 %v437_v25  ;;  %v773_v25 = vpop.permute.xlu1 %772 }
 0x22b   :  { %v923_v27 = vpop.f32.mrf.mxu1 }
 0x22c   :  { %989 = vtanh.f32 %v432_v28  ;;  %v447_v39 = vadd.f32 %v923_v27, %v318_v37 }
 0x22d   :  { %v441_v31 = vpop.f32.mrf.mxu1  ;;  %991 = vtanh.f32 %v427_v33 }
 0x22e   :  { %993 = vtanh.f32 %v422_v35  ;;  %v442_v43 = vadd.f32 %v441_v31, %v313_v42  ;;  %v473_v45 = vmax.f32 %v447_v39, 0.0 }
 0x22f   :  { %v926_v34 = vpop.f32.mrf.mxu1 }
 0x230   :  { %v457_v36 = vadd.f32 %v926_v34, %v328_v22  ;;  %v472_v46 = vmax.f32 %v442_v43, 0.0 }
 0x231   :  { %v451_v38 = vpop.f32.mrf.mxu1 }
 0x232   :  { %v475_v40 = vmax.f32 %v457_v36, 0.0  ;;  %v452_v41 = vadd.f32 %v451_v38, %v323_v29 }
 0x234   :  { %v474_v44 = vmax.f32 %v452_v41, 0.0  ;;  %927 = vmatprep.subr.mxu0 %v475_v40 }
 0x235   :  { %928 = vmatpush3.msra.mxu0 %v475_v40 }
 0x236   :  { %929 = vmatprep.subr.mxu0 %v474_v44 }
 0x237   :  { %930 = vmatpush3.msra.mxu0 %v474_v44  ;;  %v988_v47 = vpop.eup %987 }
 0x238   :  { %931 = vmatprep.subr.mxu0 %v473_v45 }
 0x239   :  { %932 = vmatpush3.msra.mxu0 %v473_v45  ;;  %v990_v48 = vpop.eup %989 }
 0x23a   :  { %933 = vmatprep.subr.mxu0 %v472_v46  ;;  %v992_v49 = vpop.eup %991 }
 0x23b   :  { %934 = vmatpush3.msra.mxu0 %v472_v46  ;;  %v994_v50 = vpop.eup %993 }
 0x23c   :  { %935 = vmatprep.subr.mxu0 %v988_v47 }
 0x23d   :  { %936 = vmatpush3.msra.mxu0 %v988_v47 }
 0x23e   :  { %937 = vmatprep.subr.mxu0 %v990_v48 }
 0x23f   :  { %938 = vmatpush3.msra.mxu0 %v990_v48 }
 0x240   :  { %939 = vmatprep.subr.mxu0 %v992_v49 }
 0x241   :  { %940 = vmatpush3.msra.mxu0 %v992_v49 }
 0x242   :  { %941 = vmatprep.subr.mxu0 %v994_v50 }
 0x243   :  { %942 = vmatpush3.msra.mxu0 %v994_v50 }
 0x244   :  { %944 = vmatmul.mubr.msk.f32.vlgmr.msra.gmra.mxu0 %vm330_vm1, %v485_v51 }
 0x245   :  { %946 = vmatprep.mubr.msk.f32.mxu0 %vm330_vm1, %v486_v52 }
 0x248   :  { %947 = vmatmul.mubr.msk.f32.gmra.mxu0 %vm330_vm1, %v487_v53 }
 0x249   :  { %949 = vmatprep.mubr.msk.f32.mxu0 %vm330_vm1, %v488_v54 }
 0x24c   :  { %950 = vmatmul.mubr.msk.f32.gmra.mxu0 %vm330_vm1, %v489_v55 }
 0x24d   :  { %952 = vmatprep.mubr.msk.f32.mxu0 %vm330_vm1, %v490_v56 }
 0x250   :  { %953 = vmatmul.mubr.msk.f32.gmra.mxu0 %vm330_vm1, %v491_v57 }
 0x304   :  { %v945_v59 = vpop.f32.mrf.mxu0 }
 0x305   :  { %v636_v16 = vadd.f32 %v945_v59, %v508_v15 }
 0x306   :  { %v630_v60 = vpop.f32.mrf.mxu0 }
 0x307   :  { %v631_v18 = vadd.f32 %v630_v60, %v503_v17 }
 0x308   :  { %v948_v61 = vpop.f32.mrf.mxu0 }
 0x309   :  { %v646_v13 = vadd.f32 %v948_v61, %v518_v10 }
 0x30a   :  { %v640_v63 = vpop.f32.mrf.mxu0 }
 0x30b   :  { %v641_v14 = vadd.f32 %v640_v63, %v513_v12 }
 0x30c   :  { %v951_v1 = vpop.f32.mrf.mxu0 }
 0x30d   :  { %v656_v9 = vadd.f32 %v951_v1, %v528_v3 }
 0x30e   :  { %v650_v2 = vpop.f32.mrf.mxu0 }
 0x30f   :  { %v651_v11 = vadd.f32 %v650_v2, %v523_v6 }
 0x310   :  { %v954_v4 = vpop.f32.mrf.mxu0 }
 0x311   :  { %v666_v5 = vadd.f32 %v954_v4, %v538_v62 }
 0x312   :  { %v660_v7 = vpop.f32.mrf.mxu0 }
 0x313   :  { %v661_v8 = vadd.f32 %v660_v7, %v533_v0  ;;  %955 = vmatprep.subr.mxu1 %v666_v5 }
 0x314   :  { %956 = vmatpush3.msra.mxu1 %v666_v5 }
 0x315   :  { %957 = vmatprep.subr.mxu1 %v661_v8 }
 0x316   :  { %958 = vmatpush3.msra.mxu1 %v661_v8 }
 0x317   :  { %959 = vmatprep.subr.mxu1 %v656_v9 }
 0x318   :  { %960 = vmatpush3.msra.mxu1 %v656_v9 }
 0x319   :  { %961 = vmatprep.subr.mxu1 %v651_v11 }
 0x31a   :  { %962 = vmatpush3.msra.mxu1 %v651_v11 }
 0x31b   :  { %963 = vmatprep.subr.mxu1 %v646_v13 }
 0x31c   :  { %964 = vmatpush3.msra.mxu1 %v646_v13 }
 0x31d   :  { %965 = vmatprep.subr.mxu1 %v641_v14 }
 0x31e   :  { %966 = vmatpush3.msra.mxu1 %v641_v14 }
 0x31f   :  { %967 = vmatprep.subr.mxu1 %v636_v16 }
 0x320   :  { %968 = vmatpush3.msra.mxu1 %v636_v16 }
 0x321   :  { %969 = vmatprep.subr.mxu1 %v631_v18 }
 0x322   :  { %970 = vmatpush3.msra.mxu1 %v631_v18 }
 0x323   :  { %972 = vmatmul.mubr.msk.f32.vlgmr.msra.gmra.mxu1 %vm330_vm1, %v670_v19 }
 0x3e3   :  { %v973_v21 = vpop.f32.mrf.mxu1 }
 0x3e5   :  { %v755_v22 = vpop.f32.mrf.mxu1 }
 0x3e6   :  { %v756_v23 = vadd.f32 %v755_v22, %v676_v20 }
 0x3e8   :  { %v764_v24 = vsub.f32 0.0, %v756_v23 }
 0x3ea   :  { %v766_v26 = vmul.f32 1.442695, %v764_v24  ;;  %v777_v27 = vmul.f32 %v773_v25, %v764_v24 }
 0x3ec   :  { %995 = vpow2.f32 %v766_v26  ;;  %779 = vst.msk [vmem:[#allocation4] sm:$0xff] %vm120_vm0, %v777_v27 }
 0x3ed   :  { %1008 = shalt.err (!%p1005_p4)
}
 0x3ee   :  { %799 = dma.vmem_to_hbm [thread:$0]  %s797_s29, 128, %s1320_s11, [#allocation5]   ;;  %v681_v28 = vpop.permute.xlu0 %680 }
 0x3ef   :  { %v761_v29 = vadd.f32 %v973_v21, %v681_v28  ;;  %s1043_s3 = smov [#allocation2]  }
 0x3f0   :  { %s786_s13 = sshll.u32 %s1043_s3, 4  ;;  %s787_s13 = int_to_ptr.vmem [resolvable:$true] %s786_s13 }
 0x3f1   :  { %v768_v31 = vsub.f32 %v1192_v30, %v761_v29  ;;  %s1017_s7 = scalar_lea.vmem %s787_s13, 128  ;;  %p1022_p6 = scmp.lt.s32.totalorder %s787_s13, %s787_s13 }
 0x3f2   :  { %p1018_p5 = scmp.ne.s32.totalorder %s787_s13, %s1017_s7  ;;  %p1023_p7 = scmp.lt.s32.totalorder %s1017_s7, %s1017_s7 }
 0x3f4   :  { %p1024_p8 = por %p1023_p7, %p1022_p6 }
 0x3f6   :  { %p1025_p9 = pnand %p1024_p8, %p1018_p5 }
 0x3f9   :  { %v996_v33 = vpop.eup %995 }
 0x3fa   :  { %v769_v34 = vmul.f32 %v996_v33, %v768_v31 }
 0x3fc   :  { %v775_v35 = vmul.f32 %v773_v25, %v769_v34 }
 0x3fe   :  { %v776_v36 = vadd.f32 %v775_v35, %v1195_v32 }
 0x400   :  { %778 = vst.msk [vmem:[#allocation2] sm:$0xff] %vm120_vm0, %v776_v36 }
 0x401   :  { %1028 = shalt.err (!%p1025_p9)
}
 0x402   :  { %789 = dma.vmem_to_hbm [thread:$0]  %s787_s13, 128, %s1319_s10, [#allocation3]  }
 0x403   :  { %1037 = dma.done.wait [#allocation3], 128  }
 0x404   :  { %1038 = vsyncadd [#allocation3], 4294967168 }
 0x405   :  { %1039 = dma.done.wait [#allocation5], 128  }
 0x406   :  { %1040 = vsyncadd [#allocation5], 4294967168 }
 0x407   :  { %806 = vsyncpa [#allocation3], 1 }
 0x408   :  { %807 = vsyncpa [#allocation5], 1 }

</bundles_post_ra>
